<compile_context>
chip_gen: v7x
topology: tpu7x:2x2x1
jax: 0.10.0
libtpu: 0.0.40
codegen_flags: <defaults>
</compile_context>

<pallas_src>
import functools

import jax
import jax.numpy as jnp
from jax import lax
from jax.experimental import pallas as pl
from jax.experimental.pallas import tpu as pltpu

LANE = 128  # pad all feature axes to the 128-lane vreg width


def _ceil_to(x, m):
    return (x + m - 1) // m * m


# ----------------------------------------------------------------------------
# Pallas kernels
# ----------------------------------------------------------------------------
def _enc_pool_kernel(p_ref, w_ref, b_ref, o_ref, *, inv_s):
    """Fused conv-as-matmul + bias + ReLU + global average pool for ONE view.

    p_ref: (1, S, Kp) im2col patches     w_ref: (Kp, 128)
    b_ref: (1, 128)                      o_ref: (1, 1, 128) pooled features
    """
    y = jnp.dot(p_ref[0], w_ref[...], preferred_element_type=jnp.float32)   # (S, 128)
    y = jnp.maximum(y + b_ref[...], 0.0)
    o_ref[0] = jnp.sum(y, axis=0, keepdims=True) * inv_s                    # (1, 128)


def _train_tail_kernel(feat_ref, wp_ref, bp_ref, wq_ref, bq_ref, o_ref,
                       *, n, k_onl, k_est):
    """Fused projector + predictor + estimate-mean + L2-normalize + cosine loss.

    feat_ref rows [0 : n*k_onl] are the online views, the rest are estimate views.
    All arrays are 128-lane padded with zeros (padding cancels in dots and norms).
    """
    feat = feat_ref[...]                                                     # (Bt, 128)
    proj = jnp.dot(feat, wp_ref[...], preferred_element_type=jnp.float32) + bp_ref[...]
    m = n * k_onl
    p = jnp.dot(proj[:m], wq_ref[...], preferred_element_type=jnp.float32) + bq_ref[...]
    fp = p.shape[-1]
    p = p.reshape(n, k_onl, fp)                                              # online preds
    z = proj[m:].reshape(n, k_est, fp)                                       # estimate projs
    e = jnp.mean(z, axis=1, keepdims=True)                                   # (n, 1, 128)

    def _l2n(v):                                                             # F.normalize
        nrm = jnp.sqrt(jnp.sum(v * v, axis=-1, keepdims=True))
        return v / jnp.maximum(nrm, 1e-12)

    sim = jnp.sum(_l2n(p) * _l2n(e), axis=-1)                                # (n, k_onl)
    o_ref[...] = jnp.reshape(-jnp.mean(sim), (1, 1))


def _proj_pred_kernel(feat_ref, wp_ref, bp_ref, wq_ref, bq_ref, proj_ref, pred_ref):
    """Fused projector + predictor for the 'embs' mode."""
    proj = jnp.dot(feat_ref[...], wp_ref[...],
                   preferred_element_type=jnp.float32) + bp_ref[...]
    pred = jnp.dot(proj, wq_ref[...],
                   preferred_element_type=jnp.float32) + bq_ref[...]
    proj_ref[...] = proj
    pred_ref[...] = pred


# ----------------------------------------------------------------------------
# Wrappers around pallas_call
# ----------------------------------------------------------------------------
def encode_views(pp, x_nchw):
    """Fused conv+ReLU+global-pool encoder. x:(B,C,H,W) -> (B, 128) padded features."""
    B, C, H, W = x_nchw.shape
    S = H * W
    Kp, FP = pp["w_conv_mat"].shape
    patches = im2col_3x3_same(x_nchw, Kp)                        # (B, S, Kp)
    kern = functools.partial(_enc_pool_kernel, inv_s=1.0 / S)
    # One view per grid step ("parallel" -> megacore sharding). For large H*W a second
    # ("arbitrary") grid axis tiling S with a resident accumulator would be added here.
    out = pl.pallas_call(
        kern,
        out_shape=jax.ShapeDtypeStruct((B, 1, FP), jnp.float32),
        grid=(B,),
        in_specs=[
            pl.BlockSpec((1, S, Kp), lambda v: (v, 0, 0)),
            pl.BlockSpec((Kp, FP), lambda v: (0, 0)),
            pl.BlockSpec((1, FP), lambda v: (0, 0)),
        ],
        out_specs=pl.BlockSpec((1, 1, FP), lambda v: (v, 0, 0)),
        compiler_params=pltpu.CompilerParams(
            dimension_semantics=("parallel",)),
    )(patches, pp["w_conv_mat"], pp["b_conv"])
    return out.reshape(B, FP)


def train_loss(pp, feat, n, k_onl, k_est):
    """feat:(n*(k_onl+k_est), 128), online rows first -> scalar loss."""
    Bt, FP = feat.shape
    kern = functools.partial(_train_tail_kernel, n=n, k_onl=k_onl, k_est=k_est)
    out = pl.pallas_call(
        kern,
        out_shape=jax.ShapeDtypeStruct((1, 1), jnp.float32),
        grid=(1,),
        in_specs=[
            pl.BlockSpec((Bt, FP), lambda i: (0, 0)),
            pl.BlockSpec((FP, FP), lambda i: (0, 0)),
            pl.BlockSpec((1, FP), lambda i: (0, 0)),
            pl.BlockSpec((FP, FP), lambda i: (0, 0)),
            pl.BlockSpec((1, FP), lambda i: (0, 0)),
        ],
        out_specs=pl.BlockSpec((1, 1), lambda i: (0, 0)),
    )(feat, pp["w_proj"], pp["b_proj"], pp["w_pred"], pp["b_pred"])
    return out[0, 0]


def proj_and_pred(pp, feat):
    """feat:(B,128) -> (proj, pred), both (B,128) padded."""
    B, FP = feat.shape
    return pl.pallas_call(
        _proj_pred_kernel,
        out_shape=(jax.ShapeDtypeStruct((B, FP), jnp.float32),
                   jax.ShapeDtypeStruct((B, FP), jnp.float32)),
        grid=(1,),
        in_specs=[
            pl.BlockSpec((B, FP), lambda i: (0, 0)),
            pl.BlockSpec((FP, FP), lambda i: (0, 0)),
            pl.BlockSpec((1, FP), lambda i: (0, 0)),
            pl.BlockSpec((FP, FP), lambda i: (0, 0)),
            pl.BlockSpec((1, FP), lambda i: (0, 0)),
        ],
        out_specs=(pl.BlockSpec((B, FP), lambda i: (0, 0)),
                   pl.BlockSpec((B, FP), lambda i: (0, 0))),
    )(feat, pp["w_proj"], pp["b_proj"], pp["w_pred"], pp["b_pred"])


# ----------------------------------------------------------------------------
# Glue (plain JAX): im2col, parameter setup / padding, module composition
# ----------------------------------------------------------------------------
def im2col_3x3_same(x_nchw, k_pad=None):
    """(B,C,H,W) -> (B, H*W, k_pad) patch rows for a 3x3 'same' conv.
       K-ordering is c*9 + ky*3 + kx, matching w.reshape(F, C*9); zero-padded to k_pad."""
    # TODO(synk): for large images, form patches in-kernel from HBM (shifted slices)
    # instead of materializing the 9x-inflated im2col matrix in HBM.
    B, C, H, W = x_nchw.shape
    xp = jnp.pad(x_nchw, ((0, 0), (0, 0), (1, 1), (1, 1)))
    cols = []
    for dy in range(3):
        for dx in range(3):
            cols.append(xp[:, :, dy:dy + H, dx:dx + W])
    p = jnp.stack(cols, axis=2)                # (B, C, 9, H, W)
    p = jnp.transpose(p, (0, 3, 4, 1, 2))      # (B, H, W, C, 9)
    p = p.reshape(B, H * W, C * 9)
    if k_pad is not None and k_pad > C * 9:
        p = jnp.pad(p, ((0, 0), (0, 0), (0, k_pad - C * 9)))
    return p


def init_params(key, c_in=3, feat_dim=32, proj_dim=32):
    k1, k2, k3, k4, k5, k6 = jax.random.split(key, 6)
    return {
        "w_conv": 0.1 * jax.random.normal(k1, (feat_dim, c_in, 3, 3), jnp.float32),
        "b_conv": 0.01 * jax.random.normal(k2, (feat_dim,), jnp.float32),
        "w_proj": 0.1 * jax.random.normal(k3, (feat_dim, proj_dim), jnp.float32),
        "b_proj": 0.01 * jax.random.normal(k4, (proj_dim,), jnp.float32),
        "w_pred": 0.1 * jax.random.normal(k5, (proj_dim, proj_dim), jnp.float32),
        "b_pred": 0.01 * jax.random.normal(k6, (proj_dim,), jnp.float32),
    }


def _pad_params(params):
    """Zero-pad all weights so feature axes are 128-lane dense and K is 8-aligned.
       Zero padding is inert through matmul + zero bias + ReLU + pool + normalize."""
    Fc, C = params["w_conv"].shape[0], params["w_conv"].shape[1]
    K = C * 9
    Kp = _ceil_to(K, 8)                                              # 27 -> 32
    P = params["w_proj"].shape[1]
    w_conv_mat = params["w_conv"].reshape(Fc, K).T                   # (K, Fc)
    w_conv_mat = jnp.pad(w_conv_mat, ((0, Kp - K), (0, LANE - Fc)))  # (Kp, 128)
    return {
        "feat_dim": Fc,
        "proj_dim": P,
        "w_conv_mat": w_conv_mat,
        "b_conv": jnp.pad(params["b_conv"][None, :], ((0, 0), (0, LANE - Fc))),
        "w_proj": jnp.pad(params["w_proj"], ((0, LANE - Fc), (0, LANE - P))),
        "b_proj": jnp.pad(params["b_proj"][None, :], ((0, 0), (0, LANE - P))),
        "w_pred": jnp.pad(params["w_pred"], ((0, LANE - P), (0, LANE - P))),
        "b_pred": jnp.pad(params["b_pred"][None, :], ((0, 0), (0, LANE - P))),
    }


def ex_eest_forward(params, x, mode, k_onl=2):
    pp = _pad_params(params)
    Fc, P = pp["feat_dim"], pp["proj_dim"]
    if mode == "train":
        n, k, C, H, W = x.shape
        k_est = k - k_onl
        data_onl = x[:, :k_onl].reshape(n * k_onl, C, H, W)
        data_est = x[:, k_onl:].reshape(n * k_est, C, H, W)
        # Single fused-encoder pass over ALL views (one pallas_call instead of four).
        feat = encode_views(pp, jnp.concatenate([data_onl, data_est], axis=0))
        m = n * k_onl
        # TODO(synk): PyTorch runs the estimate branch under no_grad (often an EMA target
        # net); stop_gradient here blocks grads into the encoder for estimate views, but
        # full no-grad through the shared projector would need a split call / custom_vjp.
        feat = jnp.concatenate([feat[:m], lax.stop_gradient(feat[m:])], axis=0)
        # Fused projector + predictor + mean + normalize + cosine loss (one pallas_call).
        return train_loss(pp, feat, n, k_onl, k_est)
    elif mode == "feat":
        return encode_views(pp, x)[:, :Fc]
    elif mode == "embs":
        feat = encode_views(pp, x)
        proj, pred = proj_and_pred(pp, feat)
        return {"feat": feat[:, :Fc], "proj": proj[:, :P], "pred": pred[:, :P]}
    else:
        raise ValueError(mode)


# ----------------------------------------------------------------------------
# Pure-JAX reference (numerical sanity check of the Pallas path)
# ----------------------------------------------------------------------------
def _ref_encoder(params, x):
    B, C, H, W = x.shape
    Fc = params["w_conv"].shape[0]
    patches = im2col_3x3_same(x)                                    # (B, H*W, C*9)
    y = jnp.maximum(patches @ params["w_conv"].reshape(Fc, C * 9).T
                    + params["b_conv"], 0.0)
    return y.mean(axis=1)                                           # (B, Fc)


def _ref_embs(params, x):
    feat = _ref_encoder(params, x)
    proj = feat @ params["w_proj"] + params["b_proj"]
    pred = proj @ params["w_pred"] + params["b_pred"]
    return feat, proj, pred


def _ref_forward_train(params, data, k_onl=2):
    n, k, C, H, W = data.shape
    k_est = k - k_onl
    onl = data[:, :k_onl].reshape(n * k_onl, C, H, W)
    est = data[:, k_onl:].reshape(n * k_est, C, H, W)
    p = (_ref_encoder(params, onl) @ params["w_proj"] + params["b_proj"])
    p = (p @ params["w_pred"] + params["b_pred"]).reshape(n, k_onl, -1)
    z = (_ref_encoder(params, est) @ params["w_proj"] + params["b_proj"])
    z = z.reshape(n, k_est, -1)
    e = z.mean(axis=1, keepdims=True)

    def nrm(v):
        return v / jnp.maximum(jnp.linalg.norm(v, axis=-1, keepdims=True), 1e-12)

    return -jnp.mean(jnp.sum(nrm(p) * nrm(e), axis=-1))


# ----------------------------------------------------------------------------
if __name__ == "__main__":
    key = jax.random.PRNGKey(0)
    pkey, dkey = jax.random.split(key)

    # data: (n, k, C, H, W); k = k_onl + k_est views per sample
    n, k_onl, k_est, C, H, W = 2, 2, 2, 3, 16, 16
    data = jax.random.normal(dkey, (n, k_onl + k_est, C, H, W), jnp.float32)

    params = init_params(pkey, c_in=C, feat_dim=32, proj_dim=32)

    # train mode: loss
    loss = ex_eest_forward(params, data, mode="train", k_onl=k_onl)
    loss = jax.block_until_ready(loss)
    ref = _ref_forward_train(params, data, k_onl=k_onl)
    assert jnp.allclose(loss, ref, atol=1e-4, rtol=1e-4), (loss, ref)

    # embs mode on a flat image batch (checks the lane-padding is inert)
    embs = ex_eest_forward(params, data[:, 0], mode="embs")
    jax.block_until_ready(embs["pred"])
    rf, rp, rq = _ref_embs(params, data[:, 0])
    assert jnp.allclose(embs["feat"], rf, atol=1e-4, rtol=1e-4)
    assert jnp.allclose(embs["proj"], rp, atol=1e-4, rtol=1e-4)
    assert jnp.allclose(embs["pred"], rq, atol=1e-4, rtol=1e-4)

    # feat mode
    feat = ex_eest_forward(params, data[:, 1], mode="feat")
    jax.block_until_ready(feat)

    print("KERNEL_OK")
</pallas_src>

<mosaic_0001>
module attributes {stable_mosaic.version = 11 : i64} {
  func.func @_enc_pool_kernel(%arg0: i32, %arg1: memref<1x256x32xf32, #tpu.memory_space<vmem>>, %arg2: memref<32x128xf32, #tpu.memory_space<vmem>>, %arg3: memref<1x128xf32, #tpu.memory_space<vmem>>, %arg4: memref<1x1x128xf32, #tpu.memory_space<vmem>>) attributes {dimension_semantics = [#tpu.dimension_semantics<parallel>], iteration_bounds = array<i64: 8>, scalar_prefetch = 0 : i64, scratch_operands = 0 : i64, tpu.core_type = #tpu.core_type<tc>, window_params = [{transform_indices = @transform_0, window_bounds = array<i64: 1, 256, 32>}, {pipeline_mode = #tpu.pipeline_mode<synchronous>, transform_indices = @transform_1, window_bounds = array<i64: 32, 128>}, {pipeline_mode = #tpu.pipeline_mode<synchronous>, transform_indices = @transform_2, window_bounds = array<i64: 1, 128>}, {transform_indices = @transform_3, window_bounds = array<i64: 1, 1, 128>}]} {
    %c0 = arith.constant 0 : index
    %c0_0 = arith.constant 0 : index
    %c0_1 = arith.constant 0 : index
    %0 = vector.load %arg1[%c0, %c0_0, %c0_1] : memref<1x256x32xf32, #tpu.memory_space<vmem>>, vector<1x256x32xf32>
    %1 = vector.shape_cast %0 : vector<1x256x32xf32> to vector<256x32xf32>
    %c0_2 = arith.constant 0 : index
    %c0_3 = arith.constant 0 : index
    %2 = vector.load %arg2[%c0_2, %c0_3] : memref<32x128xf32, #tpu.memory_space<vmem>>, vector<32x128xf32>
    %cst = arith.constant dense<0.000000e+00> : vector<256x128xf32>
    %3 = tpu.matmul %1, %2, %cst {dimension_numbers = #tpu.dot_dimension_numbers<[1], [0], [0], [1], [0, 0, 1, 1], [], []>} : vector<256x32xf32>, vector<32x128xf32>, vector<256x128xf32> -> vector<256x128xf32>
    %c0_4 = arith.constant 0 : index
    %c0_5 = arith.constant 0 : index
    %4 = vector.load %arg3[%c0_4, %c0_5] : memref<1x128xf32, #tpu.memory_space<vmem>>, vector<1x128xf32>
    %5 = vector.broadcast %4 : vector<1x128xf32> to vector<256x128xf32>
    %6 = arith.addf %3, %5 : vector<256x128xf32>
    %cst_6 = arith.constant 0.000000e+00 : f32
    %7 = vector.broadcast %cst_6 : f32 to vector<256x128xf32>
    %8 = arith.maximumf %6, %7 : vector<256x128xf32>
    %cst_7 = arith.constant dense<0.000000e+00> : vector<128xf32>
    %9 = vector.multi_reduction <add>, %8, %cst_7 [0] : vector<256x128xf32> to vector<128xf32>
    %10 = vector.shape_cast %9 : vector<128xf32> to vector<1x128xf32>
    %cst_8 = arith.constant 3.906250e-03 : f32
    %11 = vector.broadcast %cst_8 : f32 to vector<1x128xf32>
    %12 = arith.mulf %10, %11 : vector<1x128xf32>
    %c0_9 = arith.constant 0 : index
    %c0_10 = arith.constant 0 : index
    %c0_11 = arith.constant 0 : index
    %13 = vector.load %arg4[%c0_9, %c0_10, %c0_11] : memref<1x1x128xf32, #tpu.memory_space<vmem>>, vector<1x1x128xf32>
    %14 = vector.shape_cast %13 : vector<1x1x128xf32> to vector<1x128xf32>
    %15 = vector.shape_cast %12 : vector<1x128xf32> to vector<1x1x128xf32>
    tpu.vector_store %arg4[%c0_9, %c0_10, %c0_11], %15 {strides = array<i32>} : memref<1x1x128xf32, #tpu.memory_space<vmem>>, vector<1x1x128xf32>,
    return
  }
  func.func @transform_0(%arg0: i32) -> (i32, i32, i32) {
    %c0_i32 = arith.constant 0 : i32
    %c0_i32_0 = arith.constant 0 : i32
    %c0_i32_1 = arith.constant 0 : i32
    return %arg0, %c0_i32, %c0_i32_0 : i32, i32, i32
  }
  func.func @transform_1(%arg0: i32) -> (i32, i32) {
    %c0_i32 = arith.constant 0 : i32
    %c0_i32_0 = arith.constant 0 : i32
    %c0_i32_1 = arith.constant 0 : i32
    return %c0_i32, %c0_i32_0 : i32, i32
  }
  func.func @transform_2(%arg0: i32) -> (i32, i32) {
    %c0_i32 = arith.constant 0 : i32
    %c0_i32_0 = arith.constant 0 : i32
    %c0_i32_1 = arith.constant 0 : i32
    return %c0_i32, %c0_i32_0 : i32, i32
  }
  func.func @transform_3(%arg0: i32) -> (i32, i32, i32) {
    %c0_i32 = arith.constant 0 : i32
    %c0_i32_0 = arith.constant 0 : i32
    %c0_i32_1 = arith.constant 0 : i32
    return %arg0, %c0_i32, %c0_i32_0 : i32, i32, i32
  }
}

</mosaic_0001>

<bundles_post_ra>
// kernel: tpu_custom_call.1
= control target key start
LH: loop header
LB: loop body
LE: loop exit
PB: predicated region body
PF: predicated region fallthrough
CT: control target
= control target key end

     0   :  { %8 = vsyncpa [#allocation3], 0  ;;  %s1176_s0 = inlined_call_operand.vmem [shape: f32[8,256,32], index: 0, kind: input, shape index: {}]   ;;  %s1177_s1 = inlined_call_operand.vmem [shape: f32[32,128], index: 1, kind: input, shape index: {}]   ;;  %s1178_s2 = inlined_call_operand.vmem [shape: f32[1,128], index: 2, kind: input, shape index: {}]   ;;  %s1179_s3 = inlined_call_operand.hbm [shape: f32[8,1,128], index: 3, kind: output, shape index: {}]  }
   0x1   :  { %10 = vsyncpa [#allocation3 + $0x1], 0  ;;  %s943_s12 = smov 0   ;;  %s945_s13 = smov 0  }
   0x2   :  { %s947_s14 = smov 0   ;;  %s949_s15 = smov 0  }
   0x3 LB: > { %s964_s16 = sadd.s32 4294967295, %s920_s15   ;;  %s672_s17 = sadd.s32 4294967294, %s920_s15   ;;  %s920_s15 = sphi %s949_s15, %s1185_s15   ;;  %s916_s14 = sphi %s947_s14, %s1184_s14   ;;  %s912_s13 = sphi %s945_s13, %s1183_s13   ;;  %s908_s12 = sphi %s943_s12, %s1182_s12  }
   0x4   : > { %s968_s18 = sadd.s32 1, %s920_s15   ;;  %s91_s19 = sadd.s32 1, %s916_s14 }
   0x5   : > { %s88_s20 = ssub.s32 %s920_s15, %s968_s18  ;;  %p101_p0 = scmp.ne.s32.totalorder %s916_s14, %s912_s13 }
   0x6   : > { %p89_p1 = scmp.eq.s32.totalorder %s88_s20, 0  ;;  %p102_p2 = scmp.eq.s32.totalorder %s964_s16, 7 }
   0x7   : > { %p107_p3 = scmp.ne.s32.totalorder %s912_s13, %s908_s12  ;;  %p108_p4 = scmp.eq.s32.totalorder %s672_s17, 7 }
   0x8   : > { %s979_s21 = scalar_select %p89_p1, %s916_s14, %s91_s19  }
   0x9   : > { %p981_p5 = por %p102_p2, %p101_p0  ;;  %p985_p6 = por %p108_p4, %p107_p3 }
   0xa   : > { %p675_p7 = scmp.ge.s32.totalorder %s920_s15, 1  ;;  %p140_p8 = scmp.lt.s32.totalorder %s920_s15, 9 }
   0xc   : > { %p141_p9 = pnand %p675_p7, %p140_p8 }
   0xd   : > { %v200_v0 = vld [vmem:[%s1177_s1] sm:$0xff] (!%p141_p9)  ;;  %v201_v1 = vld [vmem:[%s1177_s1 + $0x8] sm:$0xff] (!%p141_p9)  ;;  %v202_v2 = vld [vmem:[%s1177_s1 + $0x10] sm:$0xff] (!%p141_p9)  ;;  %p163_p10 = scmp.lt.s32.totalorder (!%p141_p9), %s964_s16, 7  ;;  %vm211_vm0 = vcmask (!%p141_p9), 261120   ;;  %s161_s17 = sand.u32 (!%p141_p9), 1, %s912_s13  }
   0xe   : > { %144 = sbr.rel (%p141_p9) target bundleno = 336 (0x150), region = 32  ;;  %v807_v3 = vpack.c.bf16 (!%p141_p9), %v201_v1, %v200_v0  ;;  %v203_v4 = vld [vmem:[%s1177_s1 + $0x18] sm:$0xff] (!%p141_p9)  ;;  %v1077_v38 = vld [vmem:[%s1178_s2] ss:$0 sm:$0xff] (!%p141_p9)  ;;  %s711_s19 = sshll.u32 (!%p141_p9), %s964_s16, 4 }
   0xf   : > { %v811_v5 = vpack.c.bf16 (!%p141_p9), %v203_v4, %v202_v2  ;;  %s162_s20 = scalar_lea.vmem (!%p141_p9), [#allocation2], %s161_s17  ;;  %s1134_s27 = scalar_lea.hbm (!%p141_p9), %s1179_s3, %s711_s19 }
  0x10   : > { %808 = vmatprep.subr.bf16.mxu0 (!%p141_p9), %v807_v3  ;;  %815 = vmatprep.subr.bf16.mxu1 (!%p141_p9), %v807_v3  ;;  %s617_s24 = sshll.u32 (!%p141_p9), %s162_s20, 4  ;;  %s605_s28 = scalar_lea.sflag (!%p141_p9), [#allocation3], %s161_s17  ;;  %s1136_s24 = int_to_ptr.vmem [resolvable:$true] %s617_s24 }
  0x11   : > { %810 = vmatpush3.bf16.msra.mxu0 (!%p141_p9), %v807_v3  ;;  %817 = vmatpush3.bf16.msra.mxu1 (!%p141_p9), %v807_v3  ;;  %s858_s29 = scalar_lea.vmem (!%p141_p9), %s1136_s24, 16 }
  0x12   : > { %812 = vmatprep.subr.bf16.mxu0 (!%p141_p9), %v811_v5  ;;  %816 = vmatprep.subr.bf16.mxu1 (!%p141_p9), %v811_v5  ;;  %p859_p11 = scmp.ne.s32.totalorder (!%p141_p9), %s1136_s24, %s858_s29 }
  0x14   : > { %p860_p12 = pnand (!%p141_p9), %p859_p11, %p981_p5 }
  0x15   : > { %s164_s5 = scalar_select %p163_p10, %s964_s16, 7  ;;  %814 = vmatpush3.bf16.msra.mxu0 %v811_v5  ;;  %818 = vmatpush3.bf16.msra.mxu1 %v811_v5 }
  0x16   : > { %p861_p13 = pneg %p860_p12  ;;  %s922_s16 = smov [#allocation2]  }
  0x17   : > { %s714_s6 = sshll.u32 %s164_s5, 8  ;;  %s862_s30 = sshll.u32 %s922_s16, 4  ;;  %s863_s30 = int_to_ptr.vmem [resolvable:$false] %s862_s30 }
  0x18   : > { %s1008_s9 = scalar_lea.vmem %s1176_s0, %s714_s6  ;;  %s864_s4 = scalar_lea.vmem %s863_s30, 32 }
  0x19   : > { %v168_v6 = vld [vmem:[%s1008_s9] sm:$0xff]  ;;  %v169_v7 = vld [vmem:[%s1008_s9 + $0x8] sm:$0xff]  ;;  %v170_v8 = vld [vmem:[%s1008_s9 + $0x10] sm:$0xff]  ;;  %p865_p0 = scmp.lt.s32.totalorder %s1136_s24, %s863_s30  ;;  %p866_p1 = scmp.lt.s32.totalorder %s864_s4, %s858_s29 }
  0x1a   : > { %759 = vmatprep.mubr.msk.f32.mxu0 %vm211_vm0, %v168_v6  ;;  %v184_v9 = vld [vmem:[%s1008_s9 + $0x80] sm:$0xff]  ;;  %v185_v10 = vld [vmem:[%s1008_s9 + $0x88] sm:$0xff]  ;;  %v171_v11 = vld [vmem:[%s1008_s9 + $0x18] sm:$0xff] }
  0x1b   : > { %760 = vmatmul.mubr.msk.f32.vlgmr.msra.gmra.mrb[0].mxu0 %vm211_vm0, %v169_v7  ;;  %783 = vmatprep.mubr.msk.f32.mxu1 %vm211_vm0, %v184_v9  ;;  %v186_v12 = vld [vmem:[%s1008_s9 + $0x90] sm:$0xff]  ;;  %v172_v13 = vld [vmem:[%s1008_s9 + $0x20] sm:$0xff]  ;;  %v187_v14 = vld [vmem:[%s1008_s9 + $0x98] sm:$0xff]  ;;  %p867_p2 = por %p866_p1, %p865_p0 }
  0x1c   : > { %762 = vmatprep.mubr.msk.f32.mxu0 %vm211_vm0, %v170_v8  ;;  %784 = vmatmul.mubr.msk.f32.vlgmr.msra.gmra.mrb[0].mxu1 %vm211_vm0, %v185_v10  ;;  %v188_v15 = vld [vmem:[%s1008_s9 + $0xa0] sm:$0xff]  ;;  %v173_v16 = vld [vmem:[%s1008_s9 + $0x28] sm:$0xff]  ;;  %v174_v17 = vld [vmem:[%s1008_s9 + $0x30] sm:$0xff] }
  0x1d   : > { %786 = vmatprep.mubr.msk.f32.mxu1 %vm211_vm0, %v186_v12  ;;  %v189_v18 = vld [vmem:[%s1008_s9 + $0xa8] sm:$0xff]  ;;  %v190_v19 = vld [vmem:[%s1008_s9 + $0xb0] sm:$0xff]  ;;  %v175_v20 = vld [vmem:[%s1008_s9 + $0x38] sm:$0xff]  ;;  %p868_p3 = pnand %p867_p2, %p861_p13 }
  0x1e   : > { %v176_v21 = vld [vmem:[%s1008_s9 + $0x40] sm:$0xff]  ;;  %v191_v22 = vld [vmem:[%s1008_s9 + $0xb8] sm:$0xff]  ;;  %v177_v24 = vld [vmem:[%s1008_s9 + $0x48] sm:$0xff] }
  0x1f   : > { %763 = vmatmul.mubr.msk.f32.gmra.mrb[2].mxu0 %vm211_vm0, %v171_v11  ;;  %v192_v23 = vld [vmem:[%s1008_s9 + $0xc0] sm:$0xff]  ;;  %v178_v25 = vld [vmem:[%s1008_s9 + $0x50] sm:$0xff]  ;;  %v193_v26 = vld [vmem:[%s1008_s9 + $0xc8] sm:$0xff] }
  0x20   : > { %765 = vmatprep.mubr.msk.f32.mxu0 %vm211_vm0, %v172_v13  ;;  %787 = vmatmul.mubr.msk.f32.gmra.mrb[2].mxu1 %vm211_vm0, %v187_v14  ;;  %v194_v27 = vld [vmem:[%s1008_s9 + $0xd0] sm:$0xff]  ;;  %v179_v28 = vld [vmem:[%s1008_s9 + $0x58] sm:$0xff]  ;;  %v180_v29 = vld [vmem:[%s1008_s9 + $0x60] sm:$0xff] }
  0x21   : > { %789 = vmatprep.mubr.msk.f32.mxu1 %vm211_vm0, %v188_v15  ;;  %v195_v30 = vld [vmem:[%s1008_s9 + $0xd8] sm:$0xff]  ;;  %v196_v31 = vld [vmem:[%s1008_s9 + $0xe0] sm:$0xff]  ;;  %v181_v32 = vld [vmem:[%s1008_s9 + $0x68] sm:$0xff] }
  0x22   : > { %v182_v33 = vld [vmem:[%s1008_s9 + $0x70] sm:$0xff]  ;;  %v197_v34 = vld [vmem:[%s1008_s9 + $0xe8] sm:$0xff]  ;;  %v183_v36 = vld [vmem:[%s1008_s9 + $0x78] sm:$0xff] }
  0x23   : > { %766 = vmatmul.mubr.msk.f32.gmra.mrb[4].mxu0 %vm211_vm0, %v173_v16  ;;  %v198_v35 = vld [vmem:[%s1008_s9 + $0xf0] sm:$0xff]  ;;  %v199_v37 = vld [vmem:[%s1008_s9 + $0xf8] sm:$0xff] }
  0x24   : > { %768 = vmatprep.mubr.msk.f32.mxu0 %vm211_vm0, %v174_v17  ;;  %790 = vmatmul.mubr.msk.f32.gmra.mrb[4].mxu1 %vm211_vm0, %v189_v18 }
  0x25   : > { %792 = vmatprep.mubr.msk.f32.mxu1 %vm211_vm0, %v190_v19 }
  0x27   : > { %769 = vmatmul.mubr.msk.f32.gmra.mrb[6].mxu0 %vm211_vm0, %v175_v20 }
  0x28   : > { %771 = vmatprep.mubr.msk.f32.mxu0 %vm211_vm0, %v176_v21  ;;  %793 = vmatmul.mubr.msk.f32.gmra.mrb[6].mxu1 %vm211_vm0, %v191_v22 }
  0x29   : > { %795 = vmatprep.mubr.msk.f32.mxu1 %vm211_vm0, %v192_v23 }
  0x2b   : > { %772 = vmatmul.mubr.msk.f32.gmra.mrb[8].mxu0 %vm211_vm0, %v177_v24 }
  0x2c   : > { %774 = vmatprep.mubr.msk.f32.mxu0 %vm211_vm0, %v178_v25  ;;  %796 = vmatmul.mubr.msk.f32.gmra.mrb[8].mxu1 %vm211_vm0, %v193_v26 }
  0x2d   : > { %798 = vmatprep.mubr.msk.f32.mxu1 %vm211_vm0, %v194_v27 }
  0x2f   : > { %775 = vmatmul.mubr.msk.f32.gmra.mrb[10].mxu0 %vm211_vm0, %v179_v28 }
  0x30   : > { %777 = vmatprep.mubr.msk.f32.mxu0 %vm211_vm0, %v180_v29  ;;  %799 = vmatmul.mubr.msk.f32.gmra.mrb[10].mxu1 %vm211_vm0, %v195_v30 }
  0x31   : > { %801 = vmatprep.mubr.msk.f32.mxu1 %vm211_vm0, %v196_v31 }
  0x33   : > { %778 = vmatmul.mubr.msk.f32.gmra.mrb[12].mxu0 %vm211_vm0, %v181_v32 }
  0x34   : > { %780 = vmatprep.mubr.msk.f32.mxu0 %vm211_vm0, %v182_v33  ;;  %802 = vmatmul.mubr.msk.f32.gmra.mrb[12].mxu1 %vm211_vm0, %v197_v34 }
  0x35   : > { %804 = vmatprep.mubr.msk.f32.mxu1 %vm211_vm0, %v198_v35 }
  0x37   : > { %781 = vmatmul.mubr.msk.f32.gmra.mrb[14].mxu0 %vm211_vm0, %v183_v36 }
  0x38   : > { %805 = vmatmul.mubr.msk.f32.gmra.mrb[14].mxu1 %vm211_vm0, %v199_v37 }
  0xee   : > { %v761_v39 = vpop.f32.mrb[0].mxu0 }
  0xef   : > { %v380_v40 = vadd.f32 %v761_v39, %v1077_v38  ;;  %v374_v41 = vpop.f32.mrb[1].mxu0  ;;  %v1081_v43 = vpop.f32.mrb[0].mxu1 }
  0xf0   : > { %v375_v42 = vadd.f32 %v1077_v38, %v374_v41  ;;  %v454_v45 = vpop.f32.mrb[1].mxu1 }
  0xf1   : > { %v534_v44 = vmax.f32 %v380_v40, 0.0 }
  0xf2   : > { %v533_v46 = vmax.f32 %v375_v42, 0.0  ;;  %v764_v47 = vpop.f32.mrb[2].mxu0 }
  0xf3   : > { %v384_v48 = vpop.f32.mrb[3].mxu0  ;;  %v390_v50 = vadd.f32 %v764_v47, %v1077_v38  ;;  %v1085_v52 = vpop.f32.mrb[2].mxu1 }
  0xf4   : > { %v565_v49 = vadd.f32 %v534_v44, %v533_v46  ;;  %v385_v51 = vadd.f32 %v1077_v38, %v384_v48  ;;  %v1087_v53 = vpop.f32.mrb[3].mxu1  ;;  %v455_v46 = vadd.f32 %v1077_v38, %v454_v45 }
  0xf5   : > { %v536_v57 = vmax.f32 %v390_v50, 0.0 }
  0xf6   : > { %v535_v54 = vmax.f32 %v385_v51, 0.0  ;;  %v767_v55 = vpop.f32.mrb[4].mxu0 }
  0xf7   : > { %v394_v56 = vpop.f32.mrb[5].mxu0  ;;  %v400_v59 = vadd.f32 %v767_v55, %v1077_v38  ;;  %v1091_v61 = vpop.f32.mrb[4].mxu1 }
  0xf8   : > { %v566_v58 = vadd.f32 %v565_v49, %v535_v54  ;;  %v395_v60 = vadd.f32 %v1077_v38, %v394_v56  ;;  %v1093_v62 = vpop.f32.mrb[5].mxu1 }
  0xf9   : > { %v538_v3 = vmax.f32 %v400_v59, 0.0 }
  0xfa   : > { %v537_v63 = vmax.f32 %v395_v60, 0.0  ;;  %v567_v0 = vadd.f32 %v566_v58, %v536_v57  ;;  %v770_v1 = vpop.f32.mrb[6].mxu0  ;;  %v460_v57 = vadd.f32 %v1081_v43, %v1077_v38  ;;  %v549_v60 = vmax.f32 %v455_v46, 0.0 }
  0xfb   : > { %v404_v2 = vpop.f32.mrb[7].mxu0  ;;  %v410_v5 = vadd.f32 %v770_v1, %v1077_v38  ;;  %v1097_v7 = vpop.f32.mrb[6].mxu1  ;;  %v480_v43 = vadd.f32 %v1091_v61, %v1077_v38 }
  0xfc   : > { %v568_v4 = vadd.f32 %v567_v0, %v537_v63  ;;  %v405_v6 = vadd.f32 %v1077_v38, %v404_v2  ;;  %v484_v8 = vpop.f32.mrb[7].mxu1  ;;  %v465_v63 = vadd.f32 %v1077_v38, %v1087_v53  ;;  %v470_v0 = vadd.f32 %v1085_v52, %v1077_v38 }
  0xfd   : > { %v540_v13 = vmax.f32 %v410_v5, 0.0  ;;  %v550_v1 = vmax.f32 %v460_v57, 0.0  ;;  %v554_v52 = vmax.f32 %v480_v43, 0.0 }
  0xfe   : > { %v539_v9 = vmax.f32 %v405_v6, 0.0  ;;  %v569_v10 = vadd.f32 %v568_v4, %v538_v3  ;;  %v773_v11 = vpop.f32.mrb[8].mxu0  ;;  %v551_v3 = vmax.f32 %v465_v63, 0.0  ;;  %v475_v4 = vadd.f32 %v1077_v38, %v1093_v62 }
  0xff   : > { %v414_v12 = vpop.f32.mrb[9].mxu0  ;;  %v420_v15 = vadd.f32 %v773_v11, %v1077_v38  ;;  %v797_v17 = vpop.f32.mrb[8].mxu1  ;;  %v552_v6 = vmax.f32 %v470_v0, 0.0  ;;  %v485_v11 = vadd.f32 %v1077_v38, %v484_v8 }
 0x100   : > { %v570_v14 = vadd.f32 %v569_v10, %v539_v9  ;;  %v415_v16 = vadd.f32 %v1077_v38, %v414_v12  ;;  %v494_v18 = vpop.f32.mrb[9].mxu1  ;;  %v553_v10 = vmax.f32 %v475_v4, 0.0  ;;  %v490_v12 = vadd.f32 %v1097_v7, %v1077_v38 }
 0x101   : > { %v542_v23 = vmax.f32 %v420_v15, 0.0  ;;  %v495_v15 = vadd.f32 %v1077_v38, %v494_v18 }
 0x102   : > { %v541_v19 = vmax.f32 %v415_v16, 0.0  ;;  %v571_v20 = vadd.f32 %v570_v14, %v540_v13  ;;  %v776_v21 = vpop.f32.mrb[10].mxu0  ;;  %v555_v14 = vmax.f32 %v485_v11, 0.0  ;;  %v556_v62 = vmax.f32 %v490_v12, 0.0 }
 0x103   : > { %v424_v22 = vpop.f32.mrb[11].mxu0  ;;  %v430_v25 = vadd.f32 %v776_v21, %v1077_v38  ;;  %v800_v27 = vpop.f32.mrb[10].mxu1  ;;  %v557_v21 = vmax.f32 %v495_v15, 0.0 }
 0x104   : > { %v572_v24 = vadd.f32 %v571_v20, %v541_v19  ;;  %v425_v26 = vadd.f32 %v1077_v38, %v424_v22  ;;  %v504_v28 = vpop.f32.mrb[11].mxu1  ;;  %v500_v20 = vadd.f32 %v797_v17, %v1077_v38  ;;  %v510_v8 = vadd.f32 %v800_v27, %v1077_v38 }
 0x105   : > { %v544_v33 = vmax.f32 %v430_v25, 0.0  ;;  %v505_v61 = vadd.f32 %v1077_v38, %v504_v28 }
 0x106   : > { %v543_v29 = vmax.f32 %v425_v26, 0.0  ;;  %v573_v30 = vadd.f32 %v572_v24, %v542_v23  ;;  %v779_v31 = vpop.f32.mrb[12].mxu0  ;;  %v558_v23 = vmax.f32 %v500_v20, 0.0 }
 0x107   : > { %v434_v32 = vpop.f32.mrb[13].mxu0  ;;  %v440_v35 = vadd.f32 %v779_v31, %v1077_v38  ;;  %v803_v37 = vpop.f32.mrb[12].mxu1  ;;  %v559_v25 = vmax.f32 %v505_v61, 0.0 }
 0x108   : > { %v574_v34 = vadd.f32 %v573_v30, %v543_v29  ;;  %v435_v36 = vadd.f32 %v1077_v38, %v434_v32  ;;  %v514_v39 = vpop.f32.mrb[13].mxu1  ;;  %v560_v29 = vmax.f32 %v510_v8, 0.0  ;;  %v520_v30 = vadd.f32 %v803_v37, %v1077_v38 }
 0x109   : > { %v546_v47 = vmax.f32 %v440_v35, 0.0  ;;  %v515_v7 = vadd.f32 %v1077_v38, %v514_v39 }
 0x10a   : > { %v545_v40 = vmax.f32 %v435_v36, 0.0  ;;  %v575_v41 = vadd.f32 %v574_v34, %v544_v33  ;;  %v782_v42 = vpop.f32.mrb[14].mxu0  ;;  %v562_v28 = vmax.f32 %v520_v30, 0.0 }
 0x10b   : > { %v444_v44 = vpop.f32.mrb[15].mxu0  ;;  %v450_v49 = vadd.f32 %v782_v42, %v1077_v38  ;;  %v806_v51 = vpop.f32.mrb[14].mxu1  ;;  %v561_v31 = vmax.f32 %v515_v7, 0.0 }
 0x10c   : > { %v576_v48 = vadd.f32 %v575_v41, %v545_v40  ;;  %v445_v50 = vadd.f32 %v1077_v38, %v444_v44  ;;  %v524_v54 = vpop.f32.mrb[15].mxu1  ;;  %v530_v27 = vadd.f32 %v806_v51, %v1077_v38 }
 0x10d   : > { %v548_v58 = vmax.f32 %v450_v49, 0.0  ;;  %v525_v17 = vadd.f32 %v1077_v38, %v524_v54 }
 0x10e   : > { %v547_v55 = vmax.f32 %v445_v50, 0.0  ;;  %v577_v56 = vadd.f32 %v576_v48, %v546_v47  ;;  %v564_v36 = vmax.f32 %v530_v27, 0.0 }
 0x10f   : > { %v563_v34 = vmax.f32 %v525_v17, 0.0 }
 0x110   : > { %v578_v59 = vadd.f32 %v577_v56, %v547_v55 }
 0x112   : > { %v579_v45 = vadd.f32 %v578_v59, %v548_v58 }
 0x114   : > { %v580_v2 = vadd.f32 %v579_v45, %v549_v60 }
 0x116   : > { %v581_v5 = vadd.f32 %v580_v2, %v550_v1 }
 0x118   : > { %v582_v9 = vadd.f32 %v581_v5, %v551_v3 }
 0x11a   : > { %v583_v53 = vadd.f32 %v582_v9, %v552_v6 }
 0x11c   : > { %v584_v13 = vadd.f32 %v583_v53, %v553_v10 }
 0x11e   : > { %v585_v16 = vadd.f32 %v584_v13, %v554_v52 }
 0x120   : > { %v586_v19 = vadd.f32 %v585_v16, %v555_v14 }
 0x122   : > { %v587_v22 = vadd.f32 %v586_v19, %v556_v62 }
 0x124   : > { %v588_v24 = vadd.f32 %v587_v22, %v557_v21 }
 0x126   : > { %v589_v26 = vadd.f32 %v588_v24, %v558_v23 }
 0x128   : > { %v590_v18 = vadd.f32 %v589_v26, %v559_v25 }
 0x12a   : > { %v591_v32 = vadd.f32 %v590_v18, %v560_v29 }
 0x12c   : > { %v592_v33 = vadd.f32 %v591_v32, %v561_v31 }
 0x12e   : > { %v593_v35 = vadd.f32 %v592_v33, %v562_v28 }
 0x130   : > { %v594_v40 = vadd.f32 %v593_v35, %v563_v34 }
 0x132   : > { %v595_v39 = vadd.f32 %v594_v40, %v564_v36 }
 0x134   : > { %v596_v41 = vrot.slane %v595_v39, 4 }
 0x136   : > { %v597_v42 = vadd.f32 %v596_v41, %v595_v39 }
 0x138   : > { %v598_v44 = vrot.slane %v597_v42, 2 }
 0x13a   : > { %v599_v37 = vadd.f32 %v598_v44, %v597_v42 }
 0x13c   : > { %v600_v46 = vrot.slane %v599_v37, 1 }
 0x13e   : > { %v601_v47 = vadd.f32 %v600_v46, %v599_v37 }
 0x140   : > { %v602_v48 = vmul.f32 0.00390625, %v601_v47 }
 0x142   : > { %603 = vst [vmem:[%s162_s20] sm:$0x1] %v602_v48 }
 0x143   : > { %871 = shalt.err (!%p868_p3)
}
 0x144   : > { %s872_s5 = scalar_lea.hbm %s1134_s27, 16  ;;  %s876_s8 = scalar_lea.hbm %s1179_s3, 128 }
 0x145   : > { %p873_p4 = scmp.ne.s32.totalorder %s1134_s27, %s872_s5  ;;  %p877_p9 = scmp.lt.u32.totalorder %s1134_s27, %s1179_s3 }
 0x146   : > { %p878_p10 = scmp.lt.u32.totalorder %s876_s8, %s872_s5  ;;  %p880_p12 = scmp.lt.u32.totalorder %s872_s5, %s1134_s27 }
 0x147   : > { %p874_p7 = pnand %p873_p4, %p981_p5 }
 0x148   : > { %p879_p11 = por %p878_p10, %p877_p9 }
 0x149   : > { %p875_p8 = pneg %p874_p7 }
 0x14a   : > { %p881_p13 = por %p880_p12, %p879_p11 }
 0x14c   : > { %p882_p0 = pnand %p881_p13, %p875_p8 }
 0x14e   : > { %885 = shalt.err (!%p882_p0)
}
 0x14f   : > { %819 = dma.vmem_to_hbm [thread:$0]  (%p981_p5), %s1136_s24, 16, %s1134_s27, %s605_s28  }
 0x150 PF: > { %p825_p1 = scmp.ge.s32.totalorder %s920_s15, 2  ;;  %s629_s11 = sand.u32 1, %s908_s12  }
 0x151   : > { %s630_s17 = scalar_lea.sflag [#allocation3], %s629_s11 }
 0x152   : > { %p822_p2 = pnand %p825_p1, %p985_p6 }
 0x154   : > { %903 = dma.done.wait (!%p822_p2), %s630_s17, 16  }
 0x155   : > { %905 = vsyncadd (!%p822_p2), %s630_s17, 4294967280  ;;  %p13_p3 = scmp.ge.s32.totalorder %s968_s18, 10   ;;  %s1182_s12 = smov %s912_s13 }
 0x156   : > { %s1183_s13 = smov %s916_s14  ;;  %s1184_s14 = smov %s979_s21 }
 0x157   : > { %s1185_s15 = smov %s968_s18  ;;  %15 = sbr.rel (!%p13_p3) target bundleno = 3 (0x3), region = 67 }
 0x15e   :  { %634 = vsyncpa [#allocation3], 1 }
 0x15f   :  { %636 = vsyncpa [#allocation3 + $0x1], 1 }

</bundles_post_ra>
